<compile_context>
chip_gen: v7x
topology: tpu7x:2x2x1
jax: 0.10.0
libtpu: 0.0.40
codegen_flags: <defaults>
</compile_context>

<pallas_src>
import functools

import jax
import jax.numpy as jnp
from jax import lax
from jax.experimental import pallas as pl
from jax.experimental.pallas import tpu as pltpu


def _decomp_kernel(x_ref, xs_ref, xt_ref, *, K: int):
    # x_ref block: (1, L, Ct) -> work on the (L, Ct) slab for this (batch, C-tile).
    x = x_ref[0]
    L, Ct = x.shape
    p = K // 2

    # Row index along the sequence axis; masks the circular wrap of the rolls so
    # the result matches zero padding with count_include_pad=True (divisor = K).
    row = lax.broadcasted_iota(jnp.int32, (L, Ct), 0)
    zero = jnp.zeros((), jnp.float32)

    acc = x.astype(jnp.float32)  # j = 0 tap
    # TODO(synk): for very large K a prefix-sum / banded-matmul formulation would
    # keep VPU work O(1) in K; Autoformer uses small K (<= 25) so unroll is fine.
    for j in range(1, p + 1):
        # fwd[i] = x[(i + j) % L], valid where i + j < L
        fwd = pltpu.roll(x, shift=(L - j) % L, axis=0)
        # bwd[i] = x[(i - j) % L], valid where i - j >= 0
        bwd = pltpu.roll(x, shift=j % L, axis=0)
        acc = acc + jnp.where(row < L - j, fwd.astype(jnp.float32), zero)
        acc = acc + jnp.where(row >= j, bwd.astype(jnp.float32), zero)

    trend = acc * jnp.float32(1.0 / K)
    xt_ref[0] = trend.astype(xt_ref.dtype)
    xs_ref[0] = (x.astype(jnp.float32) - trend).astype(xs_ref.dtype)


def _pick_c_tile(L: int, c_pad: int, itemsize: int) -> int:
    # Per-element VMEM estimate: (1 input + 2 outputs) x 2 pipeline buffers in the
    # I/O dtype, plus ~3 fp32 temps (acc / rolled / masked) inside the kernel.
    bytes_per_elem = 6 * itemsize + 12
    budget = 20 * 1024 * 1024  # headroom under v7x's 64 MiB physical VMEM
    for cand in (512, 256, 128):
        if c_pad % cand == 0 and L * cand * bytes_per_elem <= budget:
            return cand
    return 128  # TODO(synk): tile L (with a p-row halo) if even 128 busts the budget


def series_decomp(x: jax.Array, kernel_size: int):
    """Series decomposition.  x: (B, L, C).  Returns (seasonal, trend)."""
    assert kernel_size % 2 == 1, "kernel_size must be odd to preserve length"
    B, L, C = x.shape

    LANE = 128
    c_pad = ((C + LANE - 1) // LANE) * LANE
    x_in = x if c_pad == C else jnp.pad(x, ((0, 0), (0, 0), (0, c_pad - C)))

    c_tile = _pick_c_tile(L, c_pad, jnp.dtype(x.dtype).itemsize)
    grid = (B, c_pad // c_tile)

    kern = functools.partial(_decomp_kernel, K=kernel_size)
    block = pl.BlockSpec((1, L, c_tile), lambda b, c: (b, 0, c))
    out_shape = (
        jax.ShapeDtypeStruct((B, L, c_pad), x.dtype),
        jax.ShapeDtypeStruct((B, L, c_pad), x.dtype),
    )
    x_s, x_t = pl.pallas_call(
        kern,
        out_shape=out_shape,
        grid=grid,
        in_specs=[block],
        # Note: if profiling shows exposed input DMA (two output streams per input
        # stream), sweep pipeline_mode=pl.Buffered(3) on the input spec.
        out_specs=(block, block),
        compiler_params=pltpu.CompilerParams(
            dimension_semantics=("parallel", "parallel")),
    )(x_in)

    if c_pad != C:
        x_s = x_s[:, :, :C]
        x_t = x_t[:, :, :C]
    return x_s, x_t


def _reference(x, kernel_size):
    # Pure-JAX reference of AvgPool1d(stride=1, padding=k//2, count_include_pad=True).
    p = kernel_size // 2
    xp = jnp.pad(x.astype(jnp.float32), ((0, 0), (p, p), (0, 0)))
    L = x.shape[1]
    acc = jnp.zeros(x.shape, jnp.float32)
    for j in range(kernel_size):
        acc = acc + xp[:, j:j + L, :]
    trend = (acc / kernel_size).astype(x.dtype)
    return x - trend, trend


if __name__ == "__main__":
    key = jax.random.PRNGKey(0)
    B, L, C = 2, 16, 8  # SeriesDecomp has no learnable parameters (AvgPool1d only)
    x = jax.random.normal(key, (B, L, C), dtype=jnp.float32)

    ok = True
    for kernel_size in (5, 25):
        x_s, x_t = series_decomp(x, kernel_size)
        jax.block_until_ready((x_s, x_t))
        ref_s, ref_t = _reference(x, kernel_size)
        ok &= bool(jnp.allclose(x_t, ref_t, atol=1e-5, rtol=1e-5))
        ok &= bool(jnp.allclose(x_s, ref_s, atol=1e-5, rtol=1e-5))

    assert ok
    print("KERNEL_OK")
</pallas_src>

<mosaic_0001>
module attributes {stable_mosaic.version = 11 : i64} {
  func.func @_decomp_kernel(%arg0: i32, %arg1: i32, %arg2: memref<1x16x128xf32, #tpu.memory_space<vmem>>, %arg3: memref<1x16x128xf32, #tpu.memory_space<vmem>>, %arg4: memref<1x16x128xf32, #tpu.memory_space<vmem>>) attributes {dimension_semantics = [#tpu.dimension_semantics<parallel>, #tpu.dimension_semantics<parallel>], iteration_bounds = array<i64: 2, 1>, scalar_prefetch = 0 : i64, scratch_operands = 0 : i64, tpu.core_type = #tpu.core_type<tc>, window_params = [{transform_indices = @transform_0, window_bounds = array<i64: 1, 16, 128>}, {transform_indices = @transform_1, window_bounds = array<i64: 1, 16, 128>}, {transform_indices = @transform_2, window_bounds = array<i64: 1, 16, 128>}]} {
    %c0 = arith.constant 0 : index
    %c0_0 = arith.constant 0 : index
    %c0_1 = arith.constant 0 : index
    %0 = vector.load %arg2[%c0, %c0_0, %c0_1] : memref<1x16x128xf32, #tpu.memory_space<vmem>>, vector<1x16x128xf32>
    %1 = vector.shape_cast %0 : vector<1x16x128xf32> to vector<16x128xf32>
    %2 = tpu.iota {dimensions = array<i32: 0>} : vector<16x128xi32>
    %c15_i32 = arith.constant 15 : i32
    %3 = tpu.dynamic_rotate %1 by %c15_i32 dim 0 : vector<16x128xf32>, i32 -> vector<16x128xf32>
    %c1_i32 = arith.constant 1 : i32
    %4 = tpu.dynamic_rotate %1 by %c1_i32 dim 0 : vector<16x128xf32>, i32 -> vector<16x128xf32>
    %c15_i32_2 = arith.constant 15 : i32
    %5 = vector.broadcast %c15_i32_2 : i32 to vector<16x128xi32>
    %6 = arith.cmpi slt, %2, %5 : vector<16x128xi32>
    %cst = arith.constant 0.000000e+00 : f32
    %7 = vector.broadcast %cst : f32 to vector<16x128xf32>
    %8 = arith.select %6, %3, %7 : vector<16x128xi1>, vector<16x128xf32>
    %9 = arith.addf %1, %8 : vector<16x128xf32>
    %c1_i32_3 = arith.constant 1 : i32
    %10 = vector.broadcast %c1_i32_3 : i32 to vector<16x128xi32>
    %11 = arith.cmpi sge, %2, %10 : vector<16x128xi32>
    %cst_4 = arith.constant 0.000000e+00 : f32
    %12 = vector.broadcast %cst_4 : f32 to vector<16x128xf32>
    %13 = arith.select %11, %4, %12 : vector<16x128xi1>, vector<16x128xf32>
    %14 = arith.addf %9, %13 : vector<16x128xf32>
    %c14_i32 = arith.constant 14 : i32
    %15 = tpu.dynamic_rotate %1 by %c14_i32 dim 0 : vector<16x128xf32>, i32 -> vector<16x128xf32>
    %c2_i32 = arith.constant 2 : i32
    %16 = tpu.dynamic_rotate %1 by %c2_i32 dim 0 : vector<16x128xf32>, i32 -> vector<16x128xf32>
    %c14_i32_5 = arith.constant 14 : i32
    %17 = vector.broadcast %c14_i32_5 : i32 to vector<16x128xi32>
    %18 = arith.cmpi slt, %2, %17 : vector<16x128xi32>
    %cst_6 = arith.constant 0.000000e+00 : f32
    %19 = vector.broadcast %cst_6 : f32 to vector<16x128xf32>
    %20 = arith.select %18, %15, %19 : vector<16x128xi1>, vector<16x128xf32>
    %21 = arith.addf %14, %20 : vector<16x128xf32>
    %c2_i32_7 = arith.constant 2 : i32
    %22 = vector.broadcast %c2_i32_7 : i32 to vector<16x128xi32>
    %23 = arith.cmpi sge, %2, %22 : vector<16x128xi32>
    %cst_8 = arith.constant 0.000000e+00 : f32
    %24 = vector.broadcast %cst_8 : f32 to vector<16x128xf32>
    %25 = arith.select %23, %16, %24 : vector<16x128xi1>, vector<16x128xf32>
    %26 = arith.addf %21, %25 : vector<16x128xf32>
    %cst_9 = arith.constant 2.000000e-01 : f32
    %27 = vector.broadcast %cst_9 : f32 to vector<16x128xf32>
    %28 = arith.mulf %26, %27 : vector<16x128xf32>
    %c0_10 = arith.constant 0 : index
    %c0_11 = arith.constant 0 : index
    %c0_12 = arith.constant 0 : index
    %29 = vector.load %arg4[%c0_10, %c0_11, %c0_12] : memref<1x16x128xf32, #tpu.memory_space<vmem>>, vector<1x16x128xf32>
    %30 = vector.shape_cast %29 : vector<1x16x128xf32> to vector<16x128xf32>
    %31 = vector.shape_cast %28 : vector<16x128xf32> to vector<1x16x128xf32>
    tpu.vector_store %arg4[%c0_10, %c0_11, %c0_12], %31 {strides = array<i32>} : memref<1x16x128xf32, #tpu.memory_space<vmem>>, vector<1x16x128xf32>,
    %32 = arith.subf %1, %28 : vector<16x128xf32>
    %c0_13 = arith.constant 0 : index
    %c0_14 = arith.constant 0 : index
    %c0_15 = arith.constant 0 : index
    %33 = vector.load %arg3[%c0_13, %c0_14, %c0_15] : memref<1x16x128xf32, #tpu.memory_space<vmem>>, vector<1x16x128xf32>
    %34 = vector.shape_cast %33 : vector<1x16x128xf32> to vector<16x128xf32>
    %35 = vector.shape_cast %32 : vector<16x128xf32> to vector<1x16x128xf32>
    tpu.vector_store %arg3[%c0_13, %c0_14, %c0_15], %35 {strides = array<i32>} : memref<1x16x128xf32, #tpu.memory_space<vmem>>, vector<1x16x128xf32>,
    return
  }
  func.func @transform_0(%arg0: i32, %arg1: i32) -> (i32, i32, i32) {
    %c0_i32 = arith.constant 0 : i32
    %c0_i32_0 = arith.constant 0 : i32
    return %arg0, %c0_i32, %arg1 : i32, i32, i32
  }
  func.func @transform_1(%arg0: i32, %arg1: i32) -> (i32, i32, i32) {
    %c0_i32 = arith.constant 0 : i32
    %c0_i32_0 = arith.constant 0 : i32
    return %arg0, %c0_i32, %arg1 : i32, i32, i32
  }
  func.func @transform_2(%arg0: i32, %arg1: i32) -> (i32, i32, i32) {
    %c0_i32 = arith.constant 0 : i32
    %c0_i32_0 = arith.constant 0 : i32
    return %arg0, %c0_i32, %arg1 : i32, i32, i32
  }
}

</mosaic_0001>

<bundles_post_ra>
// kernel: tpu_custom_call.1
= control target key start
LH: loop header
LB: loop body
LE: loop exit
PB: predicated region body
PF: predicated region fallthrough
CT: control target
= control target key end

     0   :  { %8 = vsyncpa [#allocation3], 0  ;;  %s906_s0 = inlined_call_operand.hbm [shape: f32[2,16,128], index: 0, kind: input, shape index: {}]   ;;  %s907_s1 = inlined_call_operand.hbm [shape: f32[2,16,128], index: 1, kind: output, shape index: {0}]   ;;  %s908_s2 = inlined_call_operand.hbm [shape: f32[2,16,128], index: 2, kind: output, shape index: {1}]  }
   0x1   :  { %10 = vsyncpa [#allocation3 + $0x1], 0 }
   0x2   :  { %11 = vsyncpa [#allocation4], 0 }
   0x3   :  { %13 = vsyncpa [#allocation4 + $0x1], 0 }
   0x4   :  { %14 = vsyncpa [#allocation7], 0 }
   0x5   :  { %16 = vsyncpa [#allocation7 + $0x1], 0  ;;  %s666_s9 = smov 0   ;;  %s668_s10 = smov 0  }
   0x6   :  { %s670_s11 = smov 0   ;;  %s672_s12 = smov 0  }
   0x7   :  { %s674_s13 = smov 0   ;;  %s676_s14 = smov 0  }
   0x8 LB: > { %s405_s15 = sadd.s32 4294967295, %s642_s14   ;;  %s406_s16 = sadd.s32 4294967294, %s642_s14   ;;  %s642_s14 = sphi %s676_s14, %s22_s14   ;;  %s638_s13 = sphi %s674_s13, %s923_s13   ;;  %s634_s12 = sphi %s672_s12, %s922_s12   ;;  %s630_s11 = sphi %s670_s11, %s921_s11   ;;  %s626_s10 = sphi %s668_s10, %s920_s10   ;;  %s622_s9 = sphi %s666_s9, %s919_s9  }
   0x9   : > { %s34_s17 = sadd.s32 1, %s638_s13  ;;  %s43_s18 = sadd.s32 1, %s630_s11 }
   0xa   : > { %p36_p0 = scmp.ge.s32.totalorder %s34_s17, 2  ;;  %p50_p1 = scmp.ne.s32.totalorder %s630_s11, %s626_s10 }
   0xb   : > { %p51_p2 = scmp.eq.s32.totalorder %s642_s14, 0  ;;  %p56_p3 = scmp.ne.s32.totalorder %s626_s10, %s622_s9 }
   0xc   : > { %s925_s17 = smov (%p36_p0, %s34_s17), 0  ;;  %p57_p5 = scmp.eq.s32.totalorder %s405_s15, 0 }
   0xd   : > { %p707_p4 = por %p51_p2, %p50_p1  ;;  %s38_s20 = ssub.s32 %s638_s13, %s925_s17 }
   0xe   : > { %p82_p6 = scmp.eq.s32.totalorder %s405_s15, 1  ;;  %p41_p7 = scmp.eq.s32.totalorder %s38_s20, 0 }
   0xf   : > { %p713_p8 = por %p57_p5, %p56_p3  ;;  %p88_p10 = scmp.eq.s32.totalorder %s406_s16, 1 }
  0x10   : > { %p717_p9 = por %p82_p6, %p50_p1  ;;  %p444_p13 = scmp.lt.s32.totalorder %s642_s14, 2 }
  0x11   : > { %s722_s23 = scalar_select %p41_p7, %s630_s11, %s43_s18  }
  0x12   : > { %s912_s22 = scalar_select %p717_p9, 1, 0 }
  0x13   : > { %p724_p11 = por %p88_p10, %p56_p3  ;;  %s136_s25 = sand.u32 1, %s630_s11  }
  0x14   : > { %s409_s26 = sshll.u32 %s136_s25, 4  ;;  %s424_s27 = sshll.u32 %s638_s13, 8 }
  0x15   : > { %s913_s24 = scalar_select %p724_p11, 1, 0 }
  0x16   : > { %s735_s30 = scalar_lea.hbm %s906_s0, %s424_s27  ;;  %s140_s3 = scalar_lea.vmem [#allocation2], %s409_s26 }
  0x17   : > { %s148_s4 = sshll.u32 %s140_s3, 4  ;;  %p741_p0 = pnand %p444_p13, %p707_p4  ;;  %s737_s4 = int_to_ptr.vmem [resolvable:$true] %s148_s4 }
  0x18   : > { %s746_s6 = scalar_lea.sflag [#allocation3], %s136_s25  ;;  %s498_s7 = scalar_lea.hbm %s735_s30, 256 }
  0x19   : > { %p499_p2 = scmp.ne.s32.totalorder %s735_s30, %s498_s7  ;;  %p500_p3 = pneg %p741_p0 }
  0x1a   : > { %s503_s16 = scalar_lea.hbm %s906_s0, 512  ;;  %p504_p4 = scmp.lt.u32.totalorder %s735_s30, %s906_s0 }
  0x1b   : > { %p501_p5 = pnand %p500_p3, %p499_p2  ;;  %p505_p7 = scmp.lt.u32.totalorder %s503_s16, %s498_s7 }
  0x1c   : > { %p507_p13 = scmp.lt.u32.totalorder %s498_s7, %s735_s30 }
  0x1d   : > { %p502_p6 = pneg %p501_p5  ;;  %p506_p10 = por %p505_p7, %p504_p4 }
  0x1f   : > { %p508_p12 = por %p507_p13, %p506_p10 }
  0x21   : > { %p509_p1 = pnand %p508_p12, %p502_p6 }
  0x23   : > { %512 = shalt.err (!%p509_p1)
}
  0x24   : > { %s513_s20 = scalar_lea.vmem %s737_s4, 256  ;;  %s644_s25 = smov [#allocation2]  }
  0x25   : > { %p514_p2 = scmp.ne.s32.totalorder %s737_s4, %s513_s20  ;;  %s518_s26 = sshll.u32 %s644_s25, 4  ;;  %s519_s26 = int_to_ptr.vmem [resolvable:$false] %s518_s26 }
  0x26   : > { %s520_s27 = scalar_lea.vmem %s519_s26, 512  ;;  %p521_p9 = scmp.lt.s32.totalorder %s737_s4, %s519_s26 }
  0x27   : > { %p516_p5 = pnand %p514_p2, %p500_p3  ;;  %p522_p4 = scmp.lt.s32.totalorder %s520_s27, %s513_s20 }
  0x29   : > { %p517_p11 = pneg %p516_p5  ;;  %p523_p7 = por %p522_p4, %p521_p9 }
  0x2b   : > { %p524_p10 = pnand %p523_p7, %p517_p11 }
  0x2d   : > { %527 = shalt.err (!%p524_p10)
}
  0x2e   : > { %s645_s28 = smov 128   ;;  %s646_s29 = smov 8  }
  0x2f   : > { %436 = dma.hbm_to_vmem [thread:$0]  (!%p741_p0), %s735_s30, 256, %s737_s4, %s746_s6, %s645_s28, %s645_s28, %s646_s29  }
  0x30   : > { %p156_p12 = scmp.lt.s32.totalorder %s642_s14, 3  ;;  %p915_p1 = scmp.ge.s32.totalorder %s642_s14, 1 }
  0x32   : > { %p157_p3 = pnand %p915_p1, %p156_p12 }
  0x33   : > { %s778_s3 = sand.u32 (!%p157_p3), 1, %s626_s10  }
  0x34   : > { %160 = sbr.rel (%p157_p3) target bundleno = 117 (0x75), region = 24  ;;  %s781_s7 = sshll.u32 (!%p157_p3), %s778_s3, 4 }
  0x35   : > { %s163_s8 = scalar_lea.sflag (!%p157_p3), [#allocation3], %s778_s3  ;;  %s166_s15 = scalar_lea.vmem (!%p157_p3), [#allocation2], %s781_s7 }
  0x3b   : > { %609 = dma.done.wait (%p713_p8), %s163_s8, 256  }
  0x3c   : > { %611 = vsyncadd (%p713_p8), %s163_s8, 4294967040  ;;  %v194_v0 = vlaneseq  ;;  %v192_v3 = vld [vmem:[%s166_s15] sm:$0xff]  ;;  %v789_v4 = vld [vmem:[%s166_s15 + $0x8] sm:$0xff]  ;;  %s191_s21 = scalar_lea.vmem [#allocation6], %s781_s7  ;;  %s425_s4 = sshll.u32 %s634_s12, 8 }
  0x3d   : > { %v197_v5 = vrot.slane %v192_v3, 1  ;;  %v198_v6 = vrot.slane %v789_v4, 1  ;;  %v202_v7 = vrot.slane %v192_v3, 7  ;;  %v203_v8 = vrot.slane %v789_v4, 7  ;;  %s286_s30 = sshll.u32 %s191_s21, 4  ;;  %s811_s5 = scalar_lea.vmem [#allocation5], %s781_s7  ;;  %s808_s30 = int_to_ptr.vmem [resolvable:$true] %s286_s30 }
  0x3e   : > { %v195_v1 = vshrl.u32 %v194_v0, 7  ;;  %v219_v9 = vrot.slane %v192_v3, 2  ;;  %v220_v10 = vrot.slane %v789_v4, 2  ;;  %v224_v11 = vrot.slane %v192_v3, 6  ;;  %s269_s6 = sshll.u32 %s811_s5, 4  ;;  %s817_s12 = scalar_lea.hbm %s908_s2, %s425_s4  ;;  %s819_s6 = int_to_ptr.vmem [resolvable:$true] %s269_s6 }
  0x3f   : > { %v225_v12 = vrot.slane %v789_v4, 6  ;;  %s826_s25 = scalar_lea.hbm %s907_s1, %s425_s4  ;;  %s255_s26 = scalar_lea.sflag [#allocation7], %s778_s3 }
  0x40   : > { %v196_v2 = vadd.s32 8, %v195_v1  ;;  %vm199_vm0 = vcmp.lt.s32.totalorder %v195_v1, 7  ;;  %vm204_vm1 = vcmp.lt.s32.totalorder %v195_v1, 1  ;;  %vm213_vm2 = vcmp.ge.s32.totalorder %v195_v1, 1  ;;  %s528_s27 = scalar_lea.vmem %s808_s30, 256  ;;  %p916_p9 = scmp.ne.s32.totalorder %s912_s22, 0 }
  0x41   : > { %vm221_vm3 = vcmp.lt.s32.totalorder %v195_v1, 6  ;;  %vm226_vm4 = vcmp.lt.s32.totalorder %v195_v1, 2  ;;  %v200_v13 = vsel %vm199_vm0, %v197_v5, %v198_v6  ;;  %v206_v14 = vsel %vm204_vm1, %v203_v8, %v202_v7  ;;  %p529_p8 = scmp.ne.s32.totalorder %s808_s30, %s528_s27  ;;  %s647_s28 = smov [#allocation6]  }
  0x42   : > { %vm208_vm5 = vcmp.lt.s32.totalorder %v196_v2, 15  ;;  %vm235_vm6 = vcmp.ge.s32.totalorder %v195_v1, 2  ;;  %v201_v15 = vsel %vm199_vm0, %v198_v6, %v197_v5  ;;  %v211_v16 = vadd.f32 %v200_v13, %v192_v3  ;;  %s532_s29 = sshll.u32 %s647_s28, 4  ;;  %s533_s29 = int_to_ptr.vmem [resolvable:$false] %s532_s29 }
  0x43   : > { %v215_v17 = vsel %vm213_vm2, %v206_v14, 0.0  ;;  %v228_v18 = vsel %vm226_vm4, %v225_v12, %v224_v11  ;;  %vm230_vm7 = vcmp.lt.s32.totalorder %v196_v2, 14  ;;  %v222_v19 = vsel %vm221_vm3, %v219_v9, %v220_v10  ;;  %p530_p11 = pnand %p529_p8, %p916_p9  ;;  %s534_s7 = scalar_lea.vmem %s533_s29, 512 }
  0x44   : > { %v205_v20 = vsel %vm204_vm1, %v202_v7, %v203_v8  ;;  %v210_v21 = vsel %vm208_vm5, %v201_v15, 0.0  ;;  %v223_v22 = vsel %vm221_vm3, %v220_v10, %v219_v9  ;;  %v217_v23 = vadd.f32 %v215_v17, %v211_v16  ;;  %p535_p6 = scmp.lt.s32.totalorder %s808_s30, %s533_s29  ;;  %p536_p13 = scmp.lt.s32.totalorder %s534_s7, %s528_s27 }
  0x45   : > { %v212_v24 = vadd.f32 %v210_v21, %v789_v4  ;;  %v237_v25 = vsel %vm235_vm6, %v228_v18, 0.0  ;;  %v232_v26 = vsel %vm230_vm7, %v223_v22, 0.0  ;;  %v227_v29 = vsel %vm226_vm4, %v224_v11, %v225_v12  ;;  %p531_p0 = pneg %p530_p11 }
  0x46   : > { %v233_v27 = vadd.f32 %v222_v19, %v217_v23  ;;  %p537_p2 = por %p536_p13, %p535_p6 }
  0x47   : > { %v218_v28 = vadd.f32 %v212_v24, %v205_v20 }
  0x48   : > { %v239_v30 = vadd.f32 %v237_v25, %v233_v27  ;;  %p538_p5 = pnand %p537_p2, %p531_p0 }
  0x49   : > { %v234_v31 = vadd.f32 %v232_v26, %v218_v28 }
  0x4a   : > { %v241_v32 = vmul.f32 0.2, %v239_v30 }
  0x4b   : > { %v240_v33 = vadd.f32 %v234_v31, %v227_v29 }
  0x4c   : > { %243 = vst [vmem:[%s191_s21] sm:$0xff] %v241_v32  ;;  %v245_v35 = vsub.f32 %v192_v3, %v241_v32 }
  0x4d   : > { %v242_v34 = vmul.f32 0.2, %v240_v33 }
  0x4e   : > { %247 = vst [vmem:[%s811_s5] sm:$0xff] %v245_v35 }
  0x4f   : > { %244 = vst [vmem:[%s191_s21 + $0x8] sm:$0xff] %v242_v34  ;;  %v246_v36 = vsub.f32 %v789_v4, %v242_v34 }
  0x50   : > { %541 = shalt.err (!%p538_p5)
}
  0x51   : > { %s542_s8 = scalar_lea.hbm %s817_s12, 256  ;;  %s546_s4 = scalar_lea.hbm %s908_s2, 512 }
  0x52   : > { %p543_p4 = scmp.ne.s32.totalorder %s817_s12, %s542_s8  ;;  %p547_p12 = scmp.lt.u32.totalorder %s817_s12, %s908_s2 }
  0x53   : > { %p548_p1 = scmp.lt.u32.totalorder %s546_s4, %s542_s8  ;;  %p550_p8 = scmp.lt.u32.totalorder %s542_s8, %s817_s12 }
  0x54   : > { %p544_p7 = pnand %p543_p4, %p916_p9 }
  0x55   : > { %p549_p3 = por %p548_p1, %p547_p12 }
  0x56   : > { %p545_p10 = pneg %p544_p7 }
  0x57   : > { %p551_p11 = por %p550_p8, %p549_p3 }
  0x59   : > { %p552_p0 = pnand %p551_p11, %p545_p10 }
  0x5b   : > { %555 = shalt.err (!%p552_p0)
}
  0x5c   : > { %s648_s19 = smov 128   ;;  %s649_s20 = smov 8   ;;  %248 = vst [vmem:[%s811_s5 + $0x8] sm:$0xff] %v246_v36 }
  0x5d   : > { %430 = dma.vmem_to_hbm [thread:$0]  (%p916_p9), %s808_s30, 256, %s817_s12, %s255_s26, %s648_s19, %s648_s19, %s649_s20  }
  0x5e   : > { %s250_s27 = scalar_lea.sflag [#allocation4], %s778_s3  ;;  %s556_s28 = scalar_lea.vmem %s819_s6, 256 }
  0x5f   : > { %p557_p6 = scmp.ne.s32.totalorder %s819_s6, %s556_s28  ;;  %s650_s29 = smov [#allocation5]  }
  0x60   : > { %s560_s7 = sshll.u32 %s650_s29, 4  ;;  %s561_s7 = int_to_ptr.vmem [resolvable:$false] %s560_s7 }
  0x61   : > { %p558_p13 = pnand %p557_p6, %p916_p9  ;;  %s562_s8 = scalar_lea.vmem %s561_s7, 512 }
  0x62   : > { %p563_p5 = scmp.lt.s32.totalorder %s819_s6, %s561_s7  ;;  %p564_p4 = scmp.lt.s32.totalorder %s562_s8, %s556_s28 }
  0x63   : > { %p559_p2 = pneg %p558_p13 }
  0x64   : > { %p565_p7 = por %p564_p4, %p563_p5 }
  0x66   : > { %p566_p10 = pnand %p565_p7, %p559_p2 }
  0x68   : > { %569 = shalt.err (!%p566_p10)
}
  0x69   : > { %s570_s30 = scalar_lea.hbm %s826_s25, 256  ;;  %s574_s26 = scalar_lea.hbm %s907_s1, 512 }
  0x6a   : > { %p571_p12 = scmp.ne.s32.totalorder %s826_s25, %s570_s30  ;;  %p575_p8 = scmp.lt.u32.totalorder %s826_s25, %s907_s1 }
  0x6b   : > { %p576_p11 = scmp.lt.u32.totalorder %s574_s26, %s570_s30  ;;  %p578_p6 = scmp.lt.u32.totalorder %s570_s30, %s826_s25 }
  0x6c   : > { %p572_p1 = pnand %p571_p12, %p916_p9 }
  0x6d   : > { %p577_p0 = por %p576_p11, %p575_p8 }
  0x6e   : > { %p573_p3 = pneg %p572_p1 }
  0x6f   : > { %p579_p13 = por %p578_p6, %p577_p0 }
  0x71   : > { %p580_p2 = pnand %p579_p13, %p573_p3 }
  0x73   : > { %583 = shalt.err (!%p580_p2)
}
  0x74   : > { %429 = dma.vmem_to_hbm [thread:$0]  (%p916_p9), %s819_s6, 256, %s826_s25, %s250_s27, %s648_s19, %s648_s19, %s649_s20  }
  0x75 PF: > { %s301_s4 = sand.u32 1, %s622_s9   ;;  %p917_p5 = scmp.ne.s32.totalorder %s913_s24, 0 }
  0x76   : > { %p918_p4 = scmp.ge.s32.totalorder %s642_s14, 2  ;;  %s302_s16 = scalar_lea.sflag [#allocation4], %s301_s4 }
  0x78   : > { %p438_p7 = pnand %p918_p4, %p917_p5 }
  0x7a   : > { %613 = dma.done.wait (!%p438_p7), %s302_s16, 256  }
  0x7b   : > { %615 = vsyncadd (!%p438_p7), %s302_s16, 4294967040  ;;  %s311_s22 = scalar_lea.sflag [#allocation7], %s301_s4 }
  0x7c   : > { %617 = dma.done.wait (!%p438_p7), %s311_s22, 256  }
  0x7d   : > { %619 = vsyncadd (!%p438_p7), %s311_s22, 4294967040  ;;  %s22_s14 = sadd.s32 1, %s642_s14   ;;  %s919_s9 = smov %s626_s10 }
  0x7e   : > { %p19_p10 = scmp.ge.s32.totalorder %s22_s14, 4   ;;  %s920_s10 = smov %s630_s11 }
  0x7f   : > { %s921_s11 = smov %s722_s23  ;;  %s922_s12 = smov %s638_s13 }
  0x80   : > { %s923_s13 = smov %s925_s17  ;;  %21 = sbr.rel (!%p19_p10) target bundleno = 8 (0x8), region = 86 }
  0x87   :  { %316 = vsyncpa [#allocation3], 1 }
  0x88   :  { %318 = vsyncpa [#allocation3 + $0x1], 1 }
  0x89   :  { %319 = vsyncpa [#allocation4], 1 }
  0x8a   :  { %321 = vsyncpa [#allocation4 + $0x1], 1 }
  0x8b   :  { %322 = vsyncpa [#allocation7], 1 }
  0x8c   :  { %324 = vsyncpa [#allocation7 + $0x1], 1 }

</bundles_post_ra>
